<compile_context>
chip_gen: v5e
topology: v5e:2x2
jax: 0.10.0
libtpu: 0.0.40
codegen_flags: <defaults>
</compile_context>

<pallas_src>
import functools

import jax
import jax.numpy as jnp
from jax.experimental import pallas as pl
from jax.experimental.pallas import tpu as pltpu


def _lift_kernel(x_ref, o_ref, *, input_dim):
    """o = [x | 0]  ==  x @ [I | 0] for this batch block."""
    # Full-tile, unmasked zero store first...
    o_ref[...] = jnp.zeros(o_ref.shape, o_ref.dtype)
    # ...then overwrite the first `input_dim` lanes with x (masked sub-store).
    o_ref[:, :input_dim] = x_ref[...].astype(o_ref.dtype)


def lift_pallas(x, lift, *, batch_tile=512):
    """Pallas equivalent of Lift(lift).forward(x) for 2-D x [batch, d]."""
    batch, input_dim = x.shape
    assert lift >= input_dim, "Lift output dim must be >= input feature dim"

    # Batch tile: big enough to amortize the ~0.35 us per-grid-step overhead,
    # tiny relative to VMEM on every generation (budget vs v7x's 64 MiB).
    if batch_tile < batch and batch % batch_tile == 0:
        tb = batch_tile
    else:
        tb = batch  # whole batch in one block (toy / non-divisible sizes)
    grid = (batch // tb,)

    kernel = functools.partial(_lift_kernel, input_dim=input_dim)
    return pl.pallas_call(
        kernel,
        out_shape=jax.ShapeDtypeStruct((batch, lift), x.dtype),
        grid=grid,
        in_specs=[pl.BlockSpec((tb, input_dim), lambda i: (i, 0))],
        out_specs=pl.BlockSpec((tb, lift), lambda i: (i, 0)),
        compiler_params=pltpu.CompilerParams(
            # Batch blocks are independent -> shard across v7x's 2 TensorCores.
            dimension_semantics=("parallel",)),
    )(x)


def reference_lift(x, lift):
    """Pure-JAX mirror of the PyTorch forward (explicit liftMat matmul)."""
    d = x.shape[1]
    lift_mat = jnp.concatenate(
        [jnp.eye(d, dtype=x.dtype), jnp.zeros((d, lift - d), dtype=x.dtype)],
        axis=1)
    return jnp.dot(x, lift_mat, precision=jax.lax.Precision.HIGHEST)


if __name__ == "__main__":
    # Small shapes consistent with the SIR model: 3 compartments lifted to 32.
    batch = 16
    input_dim = 3
    lift = 32
    dtype = jnp.float32

    key = jax.random.PRNGKey(0)
    x = jax.random.normal(key, (batch, input_dim), dtype)

    # batch_tile=8 so the batch grid (and the "parallel" axis) is exercised.
    out = lift_pallas(x, lift, batch_tile=8)
    out = jax.block_until_ready(out)

    ref = reference_lift(x, lift)
    expected_pad = jnp.concatenate(
        [x, jnp.zeros((batch, lift - input_dim), dtype)], axis=1)

    assert out.shape == (batch, lift)
    assert jnp.allclose(out, ref, atol=1e-6, rtol=1e-6), "mismatch vs liftMat matmul"
    assert jnp.allclose(out, expected_pad, atol=0.0, rtol=0.0), "mismatch vs zero-pad"

    print("KERNEL_OK")
</pallas_src>

<mosaic_0001>
module attributes {stable_mosaic.version = 11 : i64} {
  func.func @_lift_kernel(%arg0: i32, %arg1: memref<8x3xf32, #tpu.memory_space<vmem>>, %arg2: memref<8x32xf32, #tpu.memory_space<vmem>>) attributes {dimension_semantics = [#tpu.dimension_semantics<parallel>], iteration_bounds = array<i64: 2>, scalar_prefetch = 0 : i64, scratch_operands = 0 : i64, tpu.core_type = #tpu.core_type<tc>, window_params = [{transform_indices = @transform_0, window_bounds = array<i64: 8, 3>}, {transform_indices = @transform_1, window_bounds = array<i64: 8, 32>}]} {
    %cst = arith.constant 0.000000e+00 : f32
    %0 = vector.broadcast %cst : f32 to vector<8x32xf32>
    %c0 = arith.constant 0 : index
    %c0_0 = arith.constant 0 : index
    %1 = vector.load %arg2[%c0, %c0_0] : memref<8x32xf32, #tpu.memory_space<vmem>>, vector<8x32xf32>
    tpu.vector_store %arg2[%c0, %c0_0], %0 {strides = array<i32>} : memref<8x32xf32, #tpu.memory_space<vmem>>, vector<8x32xf32>,
    %c0_1 = arith.constant 0 : index
    %c0_2 = arith.constant 0 : index
    %2 = vector.load %arg1[%c0_1, %c0_2] : memref<8x3xf32, #tpu.memory_space<vmem>>, vector<8x3xf32>
    %c0_3 = arith.constant 0 : index
    %c0_4 = arith.constant 0 : index
    %3 = vector.load %arg2[%c0_3, %c0_4] : memref<8x32xf32, #tpu.memory_space<vmem>>, vector<8x3xf32>
    tpu.vector_store %arg2[%c0_3, %c0_4], %2 {strides = array<i32>} : memref<8x32xf32, #tpu.memory_space<vmem>>, vector<8x3xf32>,
    return
  }
  func.func @transform_0(%arg0: i32) -> (i32, i32) {
    %c0_i32 = arith.constant 0 : i32
    %c0_i32_0 = arith.constant 0 : i32
    return %arg0, %c0_i32 : i32, i32
  }
  func.func @transform_1(%arg0: i32) -> (i32, i32) {
    %c0_i32 = arith.constant 0 : i32
    %c0_i32_0 = arith.constant 0 : i32
    return %arg0, %c0_i32 : i32, i32
  }
}

</mosaic_0001>

<bundles_post_ra>
// kernel: tpu_custom_call.1
= control target key start
LH: loop header
LB: loop body
LE: loop exit
PB: predicated region body
PF: predicated region fallthrough
CT: control target
= control target key end

     0   :  { %6 = vsyncpa [#allocation3], 0  ;;  %s396_s0 = inlined_call_operand.vmem [shape: f32[16,3], index: 0, kind: input, shape index: {}]   ;;  %s397_s1 = inlined_call_operand.hbm [shape: f32[16,32], index: 1, kind: output, shape index: {}]  }
   0x1   :  { %8 = vsyncpa [#allocation3 + $0x1], 0  ;;  %s317_s6 = smov 0   ;;  %s319_s7 = smov 0  }
   0x2   :  { %s321_s8 = smov 0   ;;  %s323_s9 = smov 0  }
   0x3 LB: > { %s191_s10 = sadd.s32 4294967295, %s304_s9   ;;  %s192_s11 = sadd.s32 4294967294, %s304_s9   ;;  %s304_s9 = sphi %s323_s9, %s403_s9   ;;  %s300_s8 = sphi %s321_s8, %s402_s8   ;;  %s296_s7 = sphi %s319_s7, %s401_s7   ;;  %s292_s6 = sphi %s317_s6, %s400_s6  }
   0x4   : > { %s340_s12 = sadd.s32 1, %s304_s9   ;;  %s47_s13 = sadd.s32 1, %s300_s8 }
   0x5   : > { %s44_s14 = ssub.s32 %s304_s9, %s340_s12  ;;  %p57_p0 = scmp.ne.s32.totalorder %s300_s8, %s296_s7 }
   0x6   : > { %p45_p1 = scmp.eq.s32.totalorder %s44_s14, 0  ;;  %p58_p2 = scmp.eq.s32.totalorder %s191_s10, 1 }
   0x7   : > { %p63_p3 = scmp.ne.s32.totalorder %s296_s7, %s292_s6  ;;  %p64_p4 = scmp.eq.s32.totalorder %s192_s11, 1 }
   0x8   : > { %s350_s15 = scalar_select %p45_p1, %s300_s8, %s47_s13  }
   0x9   : > { %p352_p5 = por %p58_p2, %p57_p0  ;;  %p356_p6 = por %p64_p4, %p63_p3 }
   0xa   : > { %p195_p7 = scmp.ge.s32.totalorder %s304_s9, 1  ;;  %p89_p8 = scmp.lt.s32.totalorder %s304_s9, 3 }
   0xc   : > { %p90_p9 = pnand %p195_p7, %p89_p8 }
   0xd   : > { %s105_s18 = sand.u32 (!%p90_p9), 1, %s296_s7   ;;  %p108_p10 = scmp.lt.s32.totalorder (!%p90_p9), %s191_s10, 1 }
   0xe   : > { %93 = sbr.rel (%p90_p9) target bundleno = 30 (0x1e), region = 24  ;;  %s196_s19 = sshll.u32 (!%p90_p9), %s105_s18, 3 }
   0xf   : > { %s199_s20 = sshll.u32 (!%p90_p9), %s191_s10, 3  ;;  %s107_s21 = scalar_lea.vmem (!%p90_p9), [#allocation2], %s196_s19 }
  0x10   : > { %s128_s24 = scalar_lea.hbm (!%p90_p9), %s397_s1, %s199_s20  ;;  %s130_s25 = sshll.u32 (!%p90_p9), %s107_s21, 4  ;;  %s131_s25 = int_to_ptr.vmem [resolvable:$true] %s130_s25 }
  0x11   : > { %s132_s30 = sshll.u32 (!%p90_p9), %s128_s24, 4  ;;  %s118_s2 = scalar_lea.sflag (!%p90_p9), [#allocation3], %s105_s18  ;;  %s133_s30 = int_to_ptr.hbm [resolvable:$true] %s132_s30 }
  0x12   : > { %s256_s3 = sshra.s32 (!%p90_p9), %s133_s30, 4  ;;  %s262_s11 = scalar_lea.hbm (!%p90_p9), %s397_s1, 16  ;;  %s257_s3 = int_to_ptr.hbm [resolvable:$true] %s256_s3 }
  0x13   : > { %vm112_vm0 = vcmask 261120   ;;  %v306_v0 = vmov 0.0   ;;  %s405_s10 = smov (!%p108_p10, %s191_s10), 1  ;;  %vm115_vm1 = vcmask 23552   ;;  %s258_s4 = scalar_lea.hbm %s257_s3, 8 }
  0x14   : > { %113 = vst.msk [vmem:[%s107_s21] sm:$0xff] %vm112_vm0, %v306_v0  ;;  %s197_s26 = sshll.u32 %s405_s10, 3  ;;  %p259_p11 = scmp.ne.s32.totalorder %s257_s3, %s258_s4 }
  0x15   : > { %s111_s29 = scalar_lea.vmem %s396_s0, %s197_s26  ;;  %p263_p0 = scmp.lt.s32.totalorder %s257_s3, %s397_s1 }
  0x16   : > { %v114_v1 = vld [vmem:[%s111_s29] sm:$0xff]  ;;  %p260_p12 = pnand %p259_p11, %p352_p5  ;;  %p264_p1 = scmp.lt.s32.totalorder %s262_s11, %s258_s4 }
  0x17   : > { %116 = vst.msk [vmem:[%s107_s21] sm:$0xff] %vm115_vm1, %v114_v1 }
  0x18   : > { %p261_p13 = pneg %p260_p12  ;;  %p265_p2 = por %p264_p1, %p263_p0 }
  0x1a   : > { %p266_p3 = pnand %p265_p2, %p261_p13 }
  0x1c   : > { %269 = shalt.err (!%p266_p3)
}
  0x1d   : > { %202 = dma.vmem_to_hbm [thread:$0]  (%p352_p5), %s131_s25, 128, %s133_s30, %s118_s2  }
  0x1e PF: > { %p208_p4 = scmp.ge.s32.totalorder %s304_s9, 2  ;;  %s144_s18 = sand.u32 1, %s292_s6  }
  0x1f   : > { %s145_s19 = scalar_lea.sflag [#allocation3], %s144_s18 }
  0x20   : > { %p205_p7 = pnand %p208_p4, %p356_p6 }
  0x22   : > { %p206_p8 = pneg %p205_p7 }
  0x24   : > { %287 = dma.done.wait (%p206_p8), %s145_s19, 128  }
  0x25   : > { %289 = vsyncadd (%p206_p8), %s145_s19, 4294967168  ;;  %p11_p9 = scmp.ge.s32.totalorder %s340_s12, 4   ;;  %s400_s6 = smov %s296_s7 }
  0x26   : > { %s401_s7 = smov %s300_s8  ;;  %s402_s8 = smov %s350_s15 }
  0x27   : > { %s403_s9 = smov %s340_s12  ;;  %13 = sbr.rel (!%p11_p9) target bundleno = 3 (0x3), region = 59 }
  0x2c   :  { %151 = vsyncpa [#allocation3], 1 }
  0x2d   :  { %153 = vsyncpa [#allocation3 + $0x1], 1 }

</bundles_post_ra>
